<compile_context>
chip_gen: v5e
topology: v5e:2x2
jax: 0.10.0
libtpu: 0.0.40
codegen_flags: <defaults>
</compile_context>

<pallas_src>
import functools
import math

import jax
import jax.numpy as jnp
from jax.experimental import pallas as pl
from jax.experimental.pallas import tpu as pltpu


NEG_INF = -1e30  # finite stand-in for float('-inf') in the attention masks


def _round_up(x, m):
    return ((x + m - 1) // m) * m


def _pick_tile(m, tile):
    """Full-extent block if it fits, else an aligned tile with a cdiv grid."""
    if m <= tile:
        return m, 1
    return tile, pl.cdiv(m, tile)


# ----------------------------------------------------------------------------
# Embedding: one-hot(token) @ bf16 table (pad row of the table is zero).
# TODO(synk): for a realistic vocab replace the one-hot matmul with a
#             scalar-prefetch row gather (the (V,D) block would not fit v7x VMEM).
# ----------------------------------------------------------------------------
def _embed_kernel(tok_ref, emb_ref, o_ref):
    tok = tok_ref[...]                                       # (tm, 1) int32
    tm = tok.shape[0]
    vocab = emb_ref.shape[0]
    col = jax.lax.broadcasted_iota(jnp.int32, (tm, vocab), 1)
    onehot = (col == tok).astype(jnp.bfloat16)               # (tm, V)
    o_ref[...] = jnp.dot(onehot, emb_ref[...],
                         preferred_element_type=jnp.float32)


def embed_tokens(tokens, emb_bf16, *, tile_m=256):
    B, N = tokens.shape
    V, D = emb_bf16.shape
    M = B * N
    tok = tokens.reshape(M, 1).astype(jnp.int32)
    tm, steps = _pick_tile(M, tile_m)
    out = pl.pallas_call(
        _embed_kernel,
        out_shape=jax.ShapeDtypeStruct((M, D), jnp.float32),
        grid_spec=pltpu.PrefetchScalarGridSpec(
            num_scalar_prefetch=0,
            grid=(steps,),
            in_specs=[pl.BlockSpec((tm, 1), lambda i: (i, 0)),
                      pl.BlockSpec((V, D), lambda i: (0, 0))],
            out_specs=pl.BlockSpec((tm, D), lambda i: (i, 0)),
        ),
        compiler_params=pltpu.CompilerParams(dimension_semantics=("parallel",)),
    )(tok, emb_bf16)
    return out.reshape(B, N, D)


# ----------------------------------------------------------------------------
# dist_proj: Linear(1,D) -> tanh -> Linear(D,1), fused, lane-dense (1,M) layout.
# f32 math (v5e has no bf16 EUP); bf16 output halves the (B,N,N) bias HBM traffic.
# ----------------------------------------------------------------------------
def _dist_proj_kernel(d_ref, w1_ref, b1_ref, w2_ref, b2_ref, o_ref):
    d = d_ref[...]                                           # (1, tm) f32
    h = jnp.tanh(w1_ref[...] * d + b1_ref[...])              # (D, tm) f32
    y = jnp.dot(w2_ref[...], h,
                preferred_element_type=jnp.float32) + b2_ref[0, 0]
    o_ref[...] = y.astype(jnp.bfloat16)                      # (1, tm) bf16


def dist_proj(src_distance, w1, b1, w2, b2, *, tile_m=4096):
    B, N, _ = src_distance.shape
    D = w1.shape[0]
    M = B * N * N
    d = src_distance.reshape(1, M).astype(jnp.float32)
    tm, steps = _pick_tile(M, tile_m)
    out = pl.pallas_call(
        _dist_proj_kernel,
        out_shape=jax.ShapeDtypeStruct((1, M), jnp.bfloat16),
        grid_spec=pltpu.PrefetchScalarGridSpec(
            num_scalar_prefetch=0,
            grid=(steps,),
            in_specs=[pl.BlockSpec((1, tm), lambda i: (0, i)),
                      pl.BlockSpec((D, 1), lambda i: (0, 0)),
                      pl.BlockSpec((D, 1), lambda i: (0, 0)),
                      pl.BlockSpec((1, D), lambda i: (0, 0)),
                      pl.BlockSpec(memory_space=pltpu.MemorySpace.SMEM)],
            out_specs=pl.BlockSpec((1, tm), lambda i: (0, i)),
        ),
        compiler_params=pltpu.CompilerParams(dimension_semantics=("parallel",)),
    )(d, w1, b1, w2, b2)
    return out.reshape(B, N, N)


# ----------------------------------------------------------------------------
# Fused attention block (per batch): QKV projection, per-head softmax attention
# with dist bias + padding masks, out projection, residual add, LayerNorm1.
# TODO(synk): for realistic N, tile the KV axis flash-style instead of
#             materializing full (N,N) scores / (1,N,N) bias blocks.
# ----------------------------------------------------------------------------
def _attn_block_kernel(x_ref, bias_ref, padr_ref, padc_ref,
                       wqkv_ref, bqkv_ref, wo_ref, bo_ref, g_ref, b_ref,
                       o_ref, *, nhead, scale, eps, neg):
    n = x_ref.shape[1]
    d = x_ref.shape[2]
    dh = d // nhead

    x = x_ref[...].reshape(n, d)                             # f32 residual input
    qkv = jnp.dot(x.astype(jnp.bfloat16), wqkv_ref[...],
                  preferred_element_type=jnp.float32) + bqkv_ref[...]  # (n, 3d)

    mask = (bias_ref[...].reshape(n, n).astype(jnp.float32)
            + padr_ref[...].reshape(1, n) * neg               # padded keys
            + padc_ref[...].reshape(n, 1) * neg)              # padded queries

    head_outs = []
    for h in range(nhead):                                    # unrolled in-kernel
        q = qkv[:, h * dh:(h + 1) * dh].astype(jnp.bfloat16)
        k = qkv[:, d + h * dh:d + (h + 1) * dh].astype(jnp.bfloat16)
        v = qkv[:, 2 * d + h * dh:2 * d + (h + 1) * dh].astype(jnp.bfloat16)
        s = jax.lax.dot_general(q, k, (((1,), (1,)), ((), ())),
                                preferred_element_type=jnp.float32) * scale
        s = s + mask
        m = jnp.max(s, axis=-1, keepdims=True)
        p = jnp.exp(s - m)
        l = jnp.sum(p, axis=-1, keepdims=True)
        o = jnp.dot(p.astype(jnp.bfloat16), v,
                    preferred_element_type=jnp.float32)
        head_outs.append(o / l)
    attn = jnp.concatenate(head_outs, axis=-1)                # (n, d) f32

    y = (jnp.dot(attn.astype(jnp.bfloat16), wo_ref[...],
                 preferred_element_type=jnp.float32) + bo_ref[...]) + x
    mu = jnp.mean(y, axis=-1, keepdims=True)
    c = y - mu
    var = jnp.mean(c * c, axis=-1, keepdims=True)
    o_ref[...] = (c * jax.lax.rsqrt(var + eps) * g_ref[...]
                  + b_ref[...]).reshape(1, n, d)


def attn_block(x, bias, padr, padc, wqkv, bqkv, wo, bo, g, b,
               *, nhead, scale, eps=1e-5):
    B, N, D = x.shape
    kernel = functools.partial(_attn_block_kernel, nhead=nhead, scale=scale,
                               eps=eps, neg=NEG_INF)
    return pl.pallas_call(
        kernel,
        out_shape=jax.ShapeDtypeStruct((B, N, D), jnp.float32),
        grid_spec=pltpu.PrefetchScalarGridSpec(
            num_scalar_prefetch=0,
            grid=(B,),
            in_specs=[
                pl.BlockSpec((1, N, D), lambda bi: (bi, 0, 0)),     # x
                pl.BlockSpec((1, N, N), lambda bi: (bi, 0, 0)),     # bias (bf16)
                pl.BlockSpec((1, 1, N), lambda bi: (bi, 0, 0)),     # key pad
                pl.BlockSpec((1, N, 1), lambda bi: (bi, 0, 0)),     # query pad
                pl.BlockSpec((D, 3 * D), lambda bi: (0, 0)),        # Wqkv (bf16)
                pl.BlockSpec((1, 3 * D), lambda bi: (0, 0)),        # bqkv
                pl.BlockSpec((D, D), lambda bi: (0, 0)),            # Wo (bf16)
                pl.BlockSpec((1, D), lambda bi: (0, 0)),            # bo
                pl.BlockSpec((1, D), lambda bi: (0, 0)),            # ln1 gamma
                pl.BlockSpec((1, D), lambda bi: (0, 0)),            # ln1 beta
            ],
            out_specs=pl.BlockSpec((1, N, D), lambda bi: (bi, 0, 0)),
        ),
        compiler_params=pltpu.CompilerParams(dimension_semantics=("parallel",)),
    )(x, bias, padr, padc, wqkv, bqkv, wo, bo, g, b)


# ----------------------------------------------------------------------------
# Fused FFN block: gelu(x@W1+b1)@W2+b2, residual add, LayerNorm2.
# ----------------------------------------------------------------------------
def _ffn_block_kernel(x_ref, w1_ref, b1_ref, w2_ref, b2_ref, g_ref, bb_ref,
                      o_ref, *, eps):
    x = x_ref[...]                                            # (tm, D) f32
    h = jnp.dot(x.astype(jnp.bfloat16), w1_ref[...],
                preferred_element_type=jnp.float32) + b1_ref[...]
    # TODO(synk): PyTorch uses exact erf-GELU; tanh approximation differs ~1e-3.
    h = jax.nn.gelu(h, approximate=True)
    y = jnp.dot(h.astype(jnp.bfloat16), w2_ref[...],
                preferred_element_type=jnp.float32) + b2_ref[...]
    y = y + x
    mu = jnp.mean(y, axis=-1, keepdims=True)
    c = y - mu
    var = jnp.mean(c * c, axis=-1, keepdims=True)
    o_ref[...] = c * jax.lax.rsqrt(var + eps) * g_ref[...] + bb_ref[...]


def ffn_block(x, w1, b1, w2, b2, g, bb, *, eps=1e-5, tile_m=256):
    M, D = x.shape
    F = w1.shape[1]
    tm, steps = _pick_tile(M, tile_m)
    return pl.pallas_call(
        functools.partial(_ffn_block_kernel, eps=eps),
        out_shape=jax.ShapeDtypeStruct((M, D), jnp.float32),
        grid_spec=pltpu.PrefetchScalarGridSpec(
            num_scalar_prefetch=0,
            grid=(steps,),
            in_specs=[pl.BlockSpec((tm, D), lambda i: (i, 0)),
                      pl.BlockSpec((D, F), lambda i: (0, 0)),
                      pl.BlockSpec((1, F), lambda i: (0, 0)),
                      pl.BlockSpec((F, D), lambda i: (0, 0)),
                      pl.BlockSpec((1, D), lambda i: (0, 0)),
                      pl.BlockSpec((1, D), lambda i: (0, 0)),
                      pl.BlockSpec((1, D), lambda i: (0, 0))],
            out_specs=pl.BlockSpec((tm, D), lambda i: (i, 0)),
        ),
        compiler_params=pltpu.CompilerParams(dimension_semantics=("parallel",)),
    )(x, w1, b1, w2, b2, g, bb)


# ----------------------------------------------------------------------------
# Model: parameters + forward matching SimpleGeoFormerModel semantics.
# ----------------------------------------------------------------------------
class SimpleGeoFormerPallas:
    def __init__(self, vocab_size, pad_idx, embed_dim=128, num_layers=2,
                 nhead=8, ffn_dim=256, seed=0):
        assert embed_dim % nhead == 0
        self.pad_idx = pad_idx
        self.embed_dim = embed_dim
        self.nhead = nhead
        self.head_dim = embed_dim // nhead
        self.num_layers = num_layers

        key = jax.random.PRNGKey(seed)
        ks = iter(jax.random.split(key, 8 + 8 * num_layers))

        def nrm(shape, scale=0.02):
            return jax.random.normal(next(ks), shape, jnp.float32) * scale

        emb = nrm((vocab_size, embed_dim), 1.0 / math.sqrt(embed_dim))
        emb = emb.at[pad_idx].set(0.0)          # nn.Embedding padding_idx row = 0
        self.embed_bf16 = emb.astype(jnp.bfloat16)

        # dist_proj: Linear(1, D) -> Tanh -> Linear(D, 1)
        self.dp_w1 = nrm((embed_dim, 1), 1.0)
        self.dp_b1 = jnp.zeros((embed_dim, 1), jnp.float32)
        self.dp_w2 = nrm((1, embed_dim), 1.0 / math.sqrt(embed_dim))
        self.dp_b2 = jnp.zeros((1, 1), jnp.float32)

        self.layers = []
        for _ in range(num_layers):
            wq, wk, wv = (nrm((embed_dim, embed_dim)) for _ in range(3))
            self.layers.append(dict(
                wqkv=jnp.concatenate([wq, wk, wv], axis=1).astype(jnp.bfloat16),
                bqkv=jnp.zeros((1, 3 * embed_dim), jnp.float32),
                wo=nrm((embed_dim, embed_dim)).astype(jnp.bfloat16),
                bo=jnp.zeros((1, embed_dim), jnp.float32),
                ln1_g=jnp.ones((1, embed_dim), jnp.float32),
                ln1_b=jnp.zeros((1, embed_dim), jnp.float32),
                w_ff1=nrm((embed_dim, ffn_dim)).astype(jnp.bfloat16),
                b_ff1=jnp.zeros((1, ffn_dim), jnp.float32),
                w_ff2=nrm((ffn_dim, embed_dim)).astype(jnp.bfloat16),
                b_ff2=jnp.zeros((1, embed_dim), jnp.float32),
                ln2_g=jnp.ones((1, embed_dim), jnp.float32),
                ln2_b=jnp.zeros((1, embed_dim), jnp.float32),
            ))

    def __call__(self, src_tokens, padded_coordinates, src_distance, src_edge_type):
        del padded_coordinates, src_edge_type    # unused by the reference forward
        B, N = src_tokens.shape
        D = self.embed_dim

        padding_mask = (src_tokens == self.pad_idx)           # returned as bool
        padf = padding_mask.astype(jnp.float32)
        padr = padf.reshape(B, 1, N)                          # key padding
        padc = padf.reshape(B, N, 1)                          # query padding

        x = embed_tokens(src_tokens, self.embed_bf16)         # (B, N, D) f32
        bias = dist_proj(src_distance, self.dp_w1, self.dp_b1,
                         self.dp_w2, self.dp_b2)              # (B, N, N) bf16

        # TODO(synk): dropout(p=0.1) omitted — eval/inference semantics (identity).
        scale = 1.0 / math.sqrt(self.head_dim)
        for p in self.layers:
            x1 = attn_block(x, bias, padr, padc,
                            p["wqkv"], p["bqkv"], p["wo"], p["bo"],
                            p["ln1_g"], p["ln1_b"],
                            nhead=self.nhead, scale=scale)     # (B, N, D)
            x2 = ffn_block(x1.reshape(B * N, D),
                           p["w_ff1"], p["b_ff1"], p["w_ff2"], p["b_ff2"],
                           p["ln2_g"], p["ln2_b"])             # (B*N, D)
            x = x2.reshape(B, N, D)

        return x, padding_mask


if __name__ == "__main__":
    key = jax.random.PRNGKey(0)
    B, N = 2, 8
    vocab_size, pad_idx = 16, 0
    embed_dim, nhead, ffn_dim, num_layers = 128, 8, 256, 2

    k1, k2 = jax.random.split(key, 2)
    src_tokens = jax.random.randint(k1, (B, N), 1, vocab_size).astype(jnp.int32)
    src_tokens = src_tokens.at[1, 6:].set(pad_idx)             # some padding

    coords = jax.random.normal(k2, (B, N, 3), jnp.float32)
    diff = coords[:, :, None, :] - coords[:, None, :, :]
    src_distance = jnp.sqrt(jnp.sum(diff * diff, axis=-1) + 1e-12)   # (B, N, N)
    src_edge_type = jnp.zeros((B, N, N), jnp.int32)

    model = SimpleGeoFormerPallas(vocab_size, pad_idx, embed_dim=embed_dim,
                                  num_layers=num_layers, nhead=nhead,
                                  ffn_dim=ffn_dim, seed=0)
    encoder_rep, padding_mask = model(src_tokens, coords, src_distance, src_edge_type)
    encoder_rep = jax.block_until_ready(encoder_rep)
    padding_mask = jax.block_until_ready(padding_mask)

    assert encoder_rep.shape == (B, N, embed_dim)
    assert padding_mask.shape == (B, N)
    assert bool(jnp.all(jnp.isfinite(encoder_rep)))
    print("KERNEL_OK")
</pallas_src>

<mosaic_0001>
module attributes {stable_mosaic.version = 11 : i64} {
  func.func @_embed_kernel(%arg0: i32, %arg1: memref<16x1xi32, #tpu.memory_space<vmem>>, %arg2: memref<16x128xbf16, #tpu.memory_space<vmem>>, %arg3: memref<16x128xf32, #tpu.memory_space<vmem>>) attributes {dimension_semantics = [#tpu.dimension_semantics<parallel>], iteration_bounds = array<i64: 1>, scalar_prefetch = 0 : i64, scratch_operands = 0 : i64, tpu.core_type = #tpu.core_type<tc>, window_params = [{transform_indices = @transform_0, window_bounds = array<i64: 16, 1>}, {pipeline_mode = #tpu.pipeline_mode<synchronous>, transform_indices = @transform_1, window_bounds = array<i64: 16, 128>}, {transform_indices = @transform_2, window_bounds = array<i64: 16, 128>}]} {
    %c0 = arith.constant 0 : index
    %c0_0 = arith.constant 0 : index
    %0 = vector.load %arg1[%c0, %c0_0] : memref<16x1xi32, #tpu.memory_space<vmem>>, vector<16x1xi32>
    %1 = tpu.iota {dimensions = array<i32: 1>} : vector<16x16xi32>
    %2 = vector.broadcast %0 : vector<16x1xi32> to vector<16x16xi32>
    %3 = arith.cmpi eq, %1, %2 : vector<16x16xi32>
    %4 = arith.extui %3 : vector<16x16xi1> to vector<16x16xi32>
    %5 = arith.sitofp %4 : vector<16x16xi32> to vector<16x16xf32>
    %6 = arith.truncf %5 : vector<16x16xf32> to vector<16x16xbf16>
    %c0_1 = arith.constant 0 : index
    %c0_2 = arith.constant 0 : index
    %7 = vector.load %arg2[%c0_1, %c0_2] : memref<16x128xbf16, #tpu.memory_space<vmem>>, vector<16x128xbf16>
    %cst = arith.constant dense<0.000000e+00> : vector<16x128xf32>
    %8 = tpu.matmul %6, %7, %cst {dimension_numbers = #tpu.dot_dimension_numbers<[1], [0], [0], [1], [0, 0, 1, 1], [], []>} : vector<16x16xbf16>, vector<16x128xbf16>, vector<16x128xf32> -> vector<16x128xf32>
    %c0_3 = arith.constant 0 : index
    %c0_4 = arith.constant 0 : index
    %9 = vector.load %arg3[%c0_3, %c0_4] : memref<16x128xf32, #tpu.memory_space<vmem>>, vector<16x128xf32>
    tpu.vector_store %arg3[%c0_3, %c0_4], %8 {strides = array<i32>} : memref<16x128xf32, #tpu.memory_space<vmem>>, vector<16x128xf32>,
    return
  }
  func.func @transform_0(%arg0: i32) -> (i32, i32) {
    %c0_i32 = arith.constant 0 : i32
    %c0_i32_0 = arith.constant 0 : i32
    return %arg0, %c0_i32 : i32, i32
  }
  func.func @transform_1(%arg0: i32) -> (i32, i32) {
    %c0_i32 = arith.constant 0 : i32
    %c0_i32_0 = arith.constant 0 : i32
    %c0_i32_1 = arith.constant 0 : i32
    return %c0_i32, %c0_i32_0 : i32, i32
  }
  func.func @transform_2(%arg0: i32) -> (i32, i32) {
    %c0_i32 = arith.constant 0 : i32
    %c0_i32_0 = arith.constant 0 : i32
    return %arg0, %c0_i32 : i32, i32
  }
}

</mosaic_0001>

<bundles_post_ra>
// kernel: tpu_custom_call.1
= control target key start
LH: loop header
LB: loop body
LE: loop exit
PB: predicated region body
PF: predicated region fallthrough
CT: control target
= control target key end

     0   :  { %s148_s0 = inlined_call_operand.vmem [shape: s32[16,1], index: 0, kind: input, shape index: {}]   ;;  %s149_s1 = inlined_call_operand.vmem [shape: bf16[16,128], index: 1, kind: input, shape index: {}]   ;;  %s150_s2 = inlined_call_operand.hbm [shape: f32[16,128], index: 2, kind: output, shape index: {}]  }
   0x1   :  { %v13_v0 = vld [vmem:[%s148_s0] sm:$0xff] }
   0x2   :  { %7 = vsyncpa [#allocation3], 0  ;;  %v116_v1 = vmov 0   ;;  %v14_v2 = vld [vmem:[%s148_s0 + $0x8] sm:$0xff]  ;;  %v83_v3 = vld [vmem:[%s149_s1] sm:$0xff]  ;;  %v15_v4 = vlaneseq  ;;  %v117_v8 = vmov 0.0  }
   0x3   :  { %89 = vset.pattern.permute.xlu0 %v116_v1  ;;  %49 = vmatpush.bf16.msra.mxu0 %v83_v3  ;;  %vm38_vm2 = vcmask 130048   ;;  %s118_s0 = smov [#allocation2]   ;;  %s64_s1 = sshll.u32 %s150_s2, 4  ;;  %s65_s1 = int_to_ptr.hbm [resolvable:$true] %s64_s1 }
   0x4   :  { %18 = vperm.xlu0 %89, %v13_v0   ;;  %v16_v6 = vand.u32 127, %v15_v4  ;;  %s62_s15 = sshll.u32 %s118_s0, 4  ;;  %s119_s18 = smov 128   ;;  %s63_s15 = int_to_ptr.vmem [resolvable:$true] %s62_s15 }
   0x5   :  { %s120_s19 = smov 8  }
   0xc   :  { %21 = vperm.xlu0 %89, %v14_v2  }
  0x76   :  { %v19_v5 = vpop.permute.xlu0 %18 }
  0x77   :  { %vm23_vm0 = vcmp.eq.s32.totalorder %v16_v6, %v19_v5 }
  0x78   :  { %v76_v9 = vsel %vm23_vm0, 1.0, %v117_v8 }
  0x7e   :  { %v22_v7 = vpop.permute.xlu0 %21 }
  0x7f   :  { %vm24_vm1 = vcmp.eq.s32.totalorder %v16_v6, %v22_v7 }
  0x80   :  { %v77_v10 = vsel %vm24_vm1, 1.0, %v117_v8 }
  0x81   :  { %v29_v11 = vpack.c.bf16 %v77_v10, %v76_v9 }
  0x83   :  { %82 = vmatmul.msk.bf16.vlgmr.msra.gmra.mxu0 %vm38_vm2, %v29_v11 }
 0x100   :  { %v51_v12 = vpop.f32.mrf.mxu0 }
 0x101   :  { %56 = vst [vmem:[#allocation2] sm:$0xff] %v51_v12 }
 0x108   :  { %v53_v13 = vpop.f32.mrf.mxu0 }
 0x109   :  { %57 = vst [vmem:[#allocation2 + $0x8] sm:$0xff] %v53_v13 }
 0x10a   :  { %70 = dma.vmem_to_hbm [thread:$0]  %s63_s15, 256, %s65_s1, [#allocation3], %s119_s18, %s119_s18, %s120_s19  }
 0x10b   :  { %114 = dma.done.wait [#allocation3], 256  }
 0x10c   :  { %115 = vsyncadd [#allocation3], 4294967040 }
 0x10d   :  { %75 = vsyncpa [#allocation3], 1 }

</bundles_post_ra>
